<compile_context>
chip_gen: v6e
topology: v6e:2x2x1
jax: 0.10.0
libtpu: 0.0.40
codegen_flags: <defaults>
</compile_context>

<pallas_src>
import numpy as np
import jax
import jax.numpy as jnp
from jax.experimental import pallas as pl
from jax.experimental.pallas import tpu as pltpu

# torchvision rgb_to_grayscale weights; with r = g = b, gray(y) = _GRAY_W * y.
_GRAY_W = 0.2989 + 0.587 + 0.114


def _color_jitter_kernel(x_ref, a_ref, b_ref, o_ref):
    """x_ref/o_ref: (tr, H*W) row blocks; a_ref/b_ref: (tr, 4) per-row affine
    coefficients for the 4 (permuted) jitter steps."""
    y = x_ref[...].astype(jnp.float32)                  # (tr, HW)
    a = a_ref[...]                                      # (tr, 4)
    b = b_ref[...]                                      # (tr, 4)
    for k in range(4):                                  # statically unrolled
        # Per-row mean of the current image (contrast basis). Rows whose k-th
        # op is not contrast have b == 0, so the blend is a pure scale.
        m = jnp.mean(y, axis=-1, keepdims=True)         # (tr, 1)
        y = jnp.clip(a[:, k:k + 1] * y + b[:, k:k + 1] * m, 0.0, 1.0)
    o_ref[...] = y.astype(o_ref.dtype)


def _step_coeffs(order, fac):
    """Fold (op order, factors) into per-step affine coefficients.

    order: (C, 4) int32 permutations of {0,1,2,3}
    fac:   (C, 4) float32 (brightness, contrast, saturation, hue)
    returns A, B with step k doing  y <- clip(A[:,k]*y + B[:,k]*mean(y), 0, 1).
    """
    b_f = fac[:, 0:1]
    c_f = fac[:, 1:2]
    s_f = fac[:, 2:3]
    s_eff = s_f + (1.0 - s_f) * _GRAY_W                 # folded saturation blend
    a = jnp.where(order == 0, b_f,
        jnp.where(order == 1, c_f,
        jnp.where(order == 2, s_eff, 1.0)))             # hue -> identity scale
    b = jnp.where(order == 1, (1.0 - c_f) * _GRAY_W, 0.0)
    return a.astype(jnp.float32), b.astype(jnp.float32)


def color_jitter_pallas(x, order, factors, *, target_block_bytes=2 * 1024 * 1024):
    """x: (N, C, H, W) float in [0, 1]; order: (C, 4) int32 permutations;
    factors: (C, 4) float32 = (brightness, contrast, saturation, hue)."""
    N, C, H, W = x.shape
    HW = H * W
    NR = N * C

    # Per-(n, c)-row coefficients; row r = n*C + c shares channel c's params.
    a_c, b_c = _step_coeffs(order, factors)             # (C, 4)
    a_rows = jnp.tile(a_c, (N, 1))                      # (N*C, 4)
    b_rows = jnp.tile(b_c, (N, 1))                      # (N*C, 4)

    # Lane-dense layout: each row is one (image, channel) pair of H*W pixels.
    x2 = x.reshape(NR, HW)

    # Row tiling: keep the whole spatial extent in one block (the contrast
    # mean must never become a partial reduction); tile rows to ~2 MiB blocks.
    itemsize = jnp.dtype(x.dtype).itemsize
    max_rows = max(1, target_block_bytes // (HW * itemsize))
    if NR <= max_rows:
        tr = NR                                         # full dim: always legal
    else:
        tr = max(8, (min(max_rows, NR) // 8) * 8)       # sublane-aligned tile
    grid = (pl.cdiv(NR, tr),)

    out2 = pl.pallas_call(
        _color_jitter_kernel,
        grid=grid,
        in_specs=[
            pl.BlockSpec((tr, HW), lambda i: (i, 0)),
            pl.BlockSpec((tr, 4), lambda i: (i, 0)),
            pl.BlockSpec((tr, 4), lambda i: (i, 0)),
        ],
        out_specs=pl.BlockSpec((tr, HW), lambda i: (i, 0)),
        out_shape=jax.ShapeDtypeStruct((NR, HW), x.dtype),
        compiler_params=pltpu.CompilerParams(
            dimension_semantics=("parallel",),
            vmem_limit_bytes=32 * 1024 * 1024,          # covers v5e's 16 MiB default
        ),
    )(x2, a_rows, b_rows)

    return out2.reshape(N, C, H, W)


def make_params(key, C, brightness=0.4, contrast=0.4, saturation=0.4, hue=0.1):
    """Deterministic stand-in for ColorJitter.get_params(): one permutation and
    one factor tuple per spectral channel (the torch forward re-samples per
    channel)."""
    b_rng = (max(0.0, 1.0 - brightness), 1.0 + brightness)
    c_rng = (max(0.0, 1.0 - contrast), 1.0 + contrast)
    s_rng = (max(0.0, 1.0 - saturation), 1.0 + saturation)
    h_rng = (-hue, hue)
    orders, facs = [], []
    for _ in range(C):
        key, k1, k2, k3, k4, k5 = jax.random.split(key, 6)
        orders.append(jax.random.permutation(k1, 4))
        facs.append(jnp.stack([
            jax.random.uniform(k2, (), minval=b_rng[0], maxval=b_rng[1]),
            jax.random.uniform(k3, (), minval=c_rng[0], maxval=c_rng[1]),
            jax.random.uniform(k4, (), minval=s_rng[0], maxval=s_rng[1]),
            jax.random.uniform(k5, (), minval=h_rng[0], maxval=h_rng[1]),
        ]))
    order = jnp.stack(orders).astype(jnp.int32)          # (C, 4)
    fac = jnp.stack(facs).astype(jnp.float32)            # (C, 4)
    return order, fac


def color_jitter_ref(x, order, fac):
    """Pure-JAX reference mirroring the per-channel sequential torch semantics
    (validation only; independent of the coefficient folding)."""
    order = np.asarray(order)
    fac = np.asarray(fac)
    N, C, H, W = x.shape
    outs = []
    for i in range(C):
        y = x[:, i:i + 1].astype(jnp.float32)
        for k in range(4):
            op = int(order[i, k])
            if op == 0:
                y = jnp.clip(y * fac[i, 0], 0.0, 1.0)
            elif op == 1:
                mean = jnp.mean(y, axis=(1, 2, 3), keepdims=True) * _GRAY_W
                y = jnp.clip(fac[i, 1] * y + (1.0 - fac[i, 1]) * mean, 0.0, 1.0)
            elif op == 2:
                y = jnp.clip(fac[i, 2] * y + (1.0 - fac[i, 2]) * _GRAY_W * y,
                             0.0, 1.0)
            # op == 3 (hue): identity for grayscale-replicated channels
        outs.append(y.astype(x.dtype))
    return jnp.concatenate(outs, axis=1)


if __name__ == "__main__":
    key = jax.random.PRNGKey(0)
    kx, kp = jax.random.split(key)

    N, C, H, W = 2, 4, 16, 16
    x = jax.random.uniform(kx, (N, C, H, W), dtype=jnp.float32)  # pixels in [0,1]
    order, factors = make_params(kp, C)

    out = color_jitter_pallas(x, order, factors)
    out = jax.block_until_ready(out)

    ref = color_jitter_ref(x, order, factors)
    assert out.shape == x.shape and out.dtype == x.dtype
    np.testing.assert_allclose(np.asarray(out), np.asarray(ref),
                               atol=1e-5, rtol=1e-5)
    print("KERNEL_OK")
</pallas_src>

<mosaic_0001>
module attributes {stable_mosaic.version = 11 : i64} {
  func.func @_color_jitter_kernel(%arg0: i32, %arg1: memref<8x256xf32, #tpu.memory_space<vmem>>, %arg2: memref<8x4xf32, #tpu.memory_space<vmem>>, %arg3: memref<8x4xf32, #tpu.memory_space<vmem>>, %arg4: memref<8x256xf32, #tpu.memory_space<vmem>>) attributes {dimension_semantics = [#tpu.dimension_semantics<parallel>], iteration_bounds = array<i64: 1>, scalar_prefetch = 0 : i64, scratch_operands = 0 : i64, tpu.core_type = #tpu.core_type<tc>, window_params = [{transform_indices = @transform_0, window_bounds = array<i64: 8, 256>}, {transform_indices = @transform_1, window_bounds = array<i64: 8, 4>}, {transform_indices = @transform_2, window_bounds = array<i64: 8, 4>}, {transform_indices = @transform_3, window_bounds = array<i64: 8, 256>}]} {
    %c0 = arith.constant 0 : index
    %c0_0 = arith.constant 0 : index
    %0 = vector.load %arg1[%c0, %c0_0] : memref<8x256xf32, #tpu.memory_space<vmem>>, vector<8x256xf32>
    %c0_1 = arith.constant 0 : index
    %c0_2 = arith.constant 0 : index
    %1 = vector.load %arg2[%c0_1, %c0_2] : memref<8x4xf32, #tpu.memory_space<vmem>>, vector<8x4xf32>
    %c0_3 = arith.constant 0 : index
    %c0_4 = arith.constant 0 : index
    %2 = vector.load %arg3[%c0_3, %c0_4] : memref<8x4xf32, #tpu.memory_space<vmem>>, vector<8x4xf32>
    %cst = arith.constant dense<0.000000e+00> : vector<8xf32>
    %3 = vector.multi_reduction <add>, %0, %cst [1] : vector<8x256xf32> to vector<8xf32>
    %4 = vector.shape_cast %3 : vector<8xf32> to vector<8x1xf32>
    %cst_5 = arith.constant 2.560000e+02 : f32
    %5 = vector.broadcast %cst_5 : f32 to vector<8x1xf32>
    %6 = arith.divf %4, %5 : vector<8x1xf32>
    %7 = vector.extract_strided_slice %1 {offsets = [0, 0], sizes = [8, 1], strides = [1, 1]} : vector<8x4xf32> to vector<8x1xf32>
    %8 = vector.broadcast %7 : vector<8x1xf32> to vector<8x256xf32>
    %9 = arith.mulf %8, %0 : vector<8x256xf32>
    %10 = vector.extract_strided_slice %2 {offsets = [0, 0], sizes = [8, 1], strides = [1, 1]} : vector<8x4xf32> to vector<8x1xf32>
    %11 = arith.mulf %10, %6 : vector<8x1xf32>
    %12 = vector.broadcast %11 : vector<8x1xf32> to vector<8x256xf32>
    %13 = arith.addf %9, %12 : vector<8x256xf32>
    %cst_6 = arith.constant 0.000000e+00 : f32
    %cst_7 = arith.constant 1.000000e+00 : f32
    %14 = vector.broadcast %cst_6 : f32 to vector<8x256xf32>
    %15 = arith.maximumf %14, %13 : vector<8x256xf32>
    %16 = vector.broadcast %cst_7 : f32 to vector<8x256xf32>
    %17 = arith.minimumf %16, %15 : vector<8x256xf32>
    %cst_8 = arith.constant dense<0.000000e+00> : vector<8xf32>
    %18 = vector.multi_reduction <add>, %17, %cst_8 [1] : vector<8x256xf32> to vector<8xf32>
    %19 = vector.shape_cast %18 : vector<8xf32> to vector<8x1xf32>
    %cst_9 = arith.constant 2.560000e+02 : f32
    %20 = vector.broadcast %cst_9 : f32 to vector<8x1xf32>
    %21 = arith.divf %19, %20 : vector<8x1xf32>
    %22 = vector.extract_strided_slice %1 {offsets = [0, 1], sizes = [8, 1], strides = [1, 1]} : vector<8x4xf32> to vector<8x1xf32>
    %23 = vector.broadcast %22 : vector<8x1xf32> to vector<8x256xf32>
    %24 = arith.mulf %23, %17 : vector<8x256xf32>
    %25 = vector.extract_strided_slice %2 {offsets = [0, 1], sizes = [8, 1], strides = [1, 1]} : vector<8x4xf32> to vector<8x1xf32>
    %26 = arith.mulf %25, %21 : vector<8x1xf32>
    %27 = vector.broadcast %26 : vector<8x1xf32> to vector<8x256xf32>
    %28 = arith.addf %24, %27 : vector<8x256xf32>
    %cst_10 = arith.constant 0.000000e+00 : f32
    %cst_11 = arith.constant 1.000000e+00 : f32
    %29 = vector.broadcast %cst_10 : f32 to vector<8x256xf32>
    %30 = arith.maximumf %29, %28 : vector<8x256xf32>
    %31 = vector.broadcast %cst_11 : f32 to vector<8x256xf32>
    %32 = arith.minimumf %31, %30 : vector<8x256xf32>
    %cst_12 = arith.constant dense<0.000000e+00> : vector<8xf32>
    %33 = vector.multi_reduction <add>, %32, %cst_12 [1] : vector<8x256xf32> to vector<8xf32>
    %34 = vector.shape_cast %33 : vector<8xf32> to vector<8x1xf32>
    %cst_13 = arith.constant 2.560000e+02 : f32
    %35 = vector.broadcast %cst_13 : f32 to vector<8x1xf32>
    %36 = arith.divf %34, %35 : vector<8x1xf32>
    %37 = vector.extract_strided_slice %1 {offsets = [0, 2], sizes = [8, 1], strides = [1, 1]} : vector<8x4xf32> to vector<8x1xf32>
    %38 = vector.broadcast %37 : vector<8x1xf32> to vector<8x256xf32>
    %39 = arith.mulf %38, %32 : vector<8x256xf32>
    %40 = vector.extract_strided_slice %2 {offsets = [0, 2], sizes = [8, 1], strides = [1, 1]} : vector<8x4xf32> to vector<8x1xf32>
    %41 = arith.mulf %40, %36 : vector<8x1xf32>
    %42 = vector.broadcast %41 : vector<8x1xf32> to vector<8x256xf32>
    %43 = arith.addf %39, %42 : vector<8x256xf32>
    %cst_14 = arith.constant 0.000000e+00 : f32
    %cst_15 = arith.constant 1.000000e+00 : f32
    %44 = vector.broadcast %cst_14 : f32 to vector<8x256xf32>
    %45 = arith.maximumf %44, %43 : vector<8x256xf32>
    %46 = vector.broadcast %cst_15 : f32 to vector<8x256xf32>
    %47 = arith.minimumf %46, %45 : vector<8x256xf32>
    %cst_16 = arith.constant dense<0.000000e+00> : vector<8xf32>
    %48 = vector.multi_reduction <add>, %47, %cst_16 [1] : vector<8x256xf32> to vector<8xf32>
    %49 = vector.shape_cast %48 : vector<8xf32> to vector<8x1xf32>
    %cst_17 = arith.constant 2.560000e+02 : f32
    %50 = vector.broadcast %cst_17 : f32 to vector<8x1xf32>
    %51 = arith.divf %49, %50 : vector<8x1xf32>
    %52 = vector.extract_strided_slice %1 {offsets = [0, 3], sizes = [8, 1], strides = [1, 1]} : vector<8x4xf32> to vector<8x1xf32>
    %53 = vector.broadcast %52 : vector<8x1xf32> to vector<8x256xf32>
    %54 = arith.mulf %53, %47 : vector<8x256xf32>
    %55 = vector.extract_strided_slice %2 {offsets = [0, 3], sizes = [8, 1], strides = [1, 1]} : vector<8x4xf32> to vector<8x1xf32>
    %56 = arith.mulf %55, %51 : vector<8x1xf32>
    %57 = vector.broadcast %56 : vector<8x1xf32> to vector<8x256xf32>
    %58 = arith.addf %54, %57 : vector<8x256xf32>
    %cst_18 = arith.constant 0.000000e+00 : f32
    %cst_19 = arith.constant 1.000000e+00 : f32
    %59 = vector.broadcast %cst_18 : f32 to vector<8x256xf32>
    %60 = arith.maximumf %59, %58 : vector<8x256xf32>
    %61 = vector.broadcast %cst_19 : f32 to vector<8x256xf32>
    %62 = arith.minimumf %61, %60 : vector<8x256xf32>
    %c0_20 = arith.constant 0 : index
    %c0_21 = arith.constant 0 : index
    %63 = vector.load %arg4[%c0_20, %c0_21] : memref<8x256xf32, #tpu.memory_space<vmem>>, vector<8x256xf32>
    tpu.vector_store %arg4[%c0_20, %c0_21], %62 {strides = array<i32>} : memref<8x256xf32, #tpu.memory_space<vmem>>, vector<8x256xf32>,
    return
  }
  func.func @transform_0(%arg0: i32) -> (i32, i32) {
    %c0_i32 = arith.constant 0 : i32
    %c0_i32_0 = arith.constant 0 : i32
    return %arg0, %c0_i32 : i32, i32
  }
  func.func @transform_1(%arg0: i32) -> (i32, i32) {
    %c0_i32 = arith.constant 0 : i32
    %c0_i32_0 = arith.constant 0 : i32
    return %arg0, %c0_i32 : i32, i32
  }
  func.func @transform_2(%arg0: i32) -> (i32, i32) {
    %c0_i32 = arith.constant 0 : i32
    %c0_i32_0 = arith.constant 0 : i32
    return %arg0, %c0_i32 : i32, i32
  }
  func.func @transform_3(%arg0: i32) -> (i32, i32) {
    %c0_i32 = arith.constant 0 : i32
    %c0_i32_0 = arith.constant 0 : i32
    return %arg0, %c0_i32 : i32, i32
  }
}

</mosaic_0001>

<bundles_post_ra>
// kernel: tpu_custom_call.1
= control target key start
LH: loop header
LB: loop body
LE: loop exit
PB: predicated region body
PF: predicated region fallthrough
CT: control target
= control target key end

     0   :  { %s199_s0 = inlined_call_operand.vmem [shape: f32[8,256], index: 0, kind: input, shape index: {}]   ;;  %s200_s1 = inlined_call_operand.vmem [shape: f32[8,4], index: 1, kind: input, shape index: {}]   ;;  %s201_s2 = inlined_call_operand.vmem [shape: f32[8,4], index: 2, kind: input, shape index: {}]   ;;  %s202_s3 = inlined_call_operand.hbm [shape: f32[8,256], index: 3, kind: output, shape index: {}]  }
   0x1   :  { %v15_v0 = vld [vmem:[%s199_s0] sm:$0xff]  ;;  %v16_v1 = vld [vmem:[%s199_s0 + $0x8] sm:$0xff] }
   0x2   :  { %8 = vsyncpa [#allocation3], 0  ;;  %v19_v2 = vadd.f32 %v16_v1, %v15_v0  ;;  %v159_v3 = vmov 0   ;;  %v17_v4 = vld [vmem:[%s200_s1] sm:$0xff]  ;;  %v160_v9 = vmov 1   ;;  %v161_v21 = vmov 2  }
   0x3   :  { %130 = vset.pattern.permute.xlu0 %v159_v3  ;;  %131 = vset.pattern.permute.xlu1 %v159_v3  ;;  %v18_v6 = vld [vmem:[%s201_s2] sm:$0xff]  ;;  %v162_v36 = vmov 3   ;;  %s163_s0 = smov [#allocation2]  }
   0x4   :  { %20 = vadd.xlane.f32.xlu0 %v19_v2  ;;  %s117_s1 = sshll.u32 %s163_s0, 4  ;;  %s118_s1 = int_to_ptr.vmem [resolvable:$true] %s117_s1 }
   0x5   :  { %s137_s2 = scalar_lea.vmem %s118_s1, 256  ;;  %p142_p1 = scmp.lt.s32.totalorder %s118_s1, %s118_s1 }
   0x6   :  { %p138_p0 = scmp.ne.s32.totalorder %s118_s1, %s137_s2  ;;  %p143_p2 = scmp.lt.s32.totalorder %s137_s2, %s137_s2 }
   0x8   :  { %p144_p3 = por %p143_p2, %p142_p1 }
   0xa   :  { %p145_p4 = pnand %p144_p3, %p138_p0 }
  0x1a   :  { %26 = vperm.xlu0 %130, %v17_v4  }
  0x1e   :  { %133 = vset.pattern.permute.xlu0 %v160_v9 }
  0x8d   :  { %v21_v5 = vpop.xlane.xlu0 %20 }
  0x8e   :  { %v23_v7 = vmul.f32 0.00390625, %v21_v5 }
  0x90   :  { %v31_v8 = vmul.f32 %v23_v7, %v18_v6 }
  0x92   :  { %34 = vperm.xlu1 %131, %v31_v8  }
  0x95   :  { %v27_v10 = vpop.permute.xlu0 %26 }
  0x96   :  { %132 = vset.pattern.permute.xlu1 %v160_v9  ;;  %v29_v11 = vmul.f32 %v27_v10, %v15_v0  ;;  %v30_v12 = vmul.f32 %v27_v10, %v16_v1 }
 0x10d   :  { %v35_v13 = vpop.permute.xlu1 %34 }
 0x10e   :  { %v37_v14 = vadd.f32 %v35_v13, %v29_v11  ;;  %v38_v15 = vadd.f32 %v35_v13, %v30_v12 }
 0x110   :  { %v39_v16 = vmax.f32 %v37_v14, 0.0  ;;  %v40_v17 = vmax.f32 %v38_v15, 0.0 }
 0x112   :  { %v41_v18 = vmin.f32 %v39_v16, 1.0  ;;  %v42_v19 = vmin.f32 %v40_v17, 1.0 }
 0x114   :  { %v43_v20 = vadd.f32 %v42_v19, %v41_v18 }
 0x116   :  { %44 = vadd.xlane.f32.xlu1 %v43_v20 }
 0x127   :  { %48 = vperm.xlu1 %132, %v17_v4  }
 0x12b   :  { %134 = vset.pattern.permute.xlu1 %v161_v21 }
 0x12c   :  { %70 = vperm.xlu1 %134, %v17_v4  }
 0x19f   :  { %v45_v22 = vpop.xlane.xlu1 %44 }
 0x1a0   :  { %v46_v23 = vmul.f32 0.00390625, %v45_v22 }
 0x1a2   :  { %v53_v24 = vmul.f32 %v46_v23, %v18_v6 }
 0x1a3   :  { %v49_v25 = vpop.permute.xlu1 %48 }
 0x1a4   :  { %56 = vperm.xlu0 %133, %v53_v24   ;;  %v51_v26 = vmul.f32 %v49_v25, %v41_v18  ;;  %v52_v27 = vmul.f32 %v49_v25, %v42_v19 }
 0x1a7   :  { %v71_v40 = vpop.permute.xlu1 %70 }
 0x1a8   :  { %135 = vset.pattern.permute.xlu0 %v162_v36 }
 0x21f   :  { %v57_v28 = vpop.permute.xlu0 %56 }
 0x220   :  { %v59_v29 = vadd.f32 %v57_v28, %v51_v26  ;;  %v60_v30 = vadd.f32 %v57_v28, %v52_v27 }
 0x222   :  { %v61_v31 = vmax.f32 %v59_v29, 0.0  ;;  %v62_v32 = vmax.f32 %v60_v30, 0.0 }
 0x224   :  { %v63_v33 = vmin.f32 %v61_v31, 1.0  ;;  %v64_v34 = vmin.f32 %v62_v32, 1.0 }
 0x226   :  { %v65_v35 = vadd.f32 %v64_v34, %v63_v33  ;;  %v73_v41 = vmul.f32 %v71_v40, %v63_v33  ;;  %v74_v42 = vmul.f32 %v71_v40, %v64_v34 }
 0x228   :  { %66 = vadd.xlane.f32.xlu0 %v65_v35 }
 0x23e   :  { %92 = vperm.xlu0 %135, %v17_v4  }
 0x2b1   :  { %v67_v37 = vpop.xlane.xlu0 %66 }
 0x2b2   :  { %v68_v38 = vmul.f32 0.00390625, %v67_v37 }
 0x2b4   :  { %v75_v39 = vmul.f32 %v68_v38, %v18_v6 }
 0x2b6   :  { %78 = vperm.xlu1 %134, %v75_v39  }
 0x2b9   :  { %v93_v54 = vpop.permute.xlu0 %92 }
 0x2ba   :  { %136 = vset.pattern.permute.xlu1 %v162_v36 }
 0x331   :  { %v79_v43 = vpop.permute.xlu1 %78 }
 0x332   :  { %v81_v44 = vadd.f32 %v79_v43, %v73_v41  ;;  %v82_v45 = vadd.f32 %v79_v43, %v74_v42 }
 0x334   :  { %v83_v46 = vmax.f32 %v81_v44, 0.0  ;;  %v84_v47 = vmax.f32 %v82_v45, 0.0 }
 0x336   :  { %v85_v48 = vmin.f32 %v83_v46, 1.0  ;;  %v86_v49 = vmin.f32 %v84_v47, 1.0 }
 0x338   :  { %v87_v50 = vadd.f32 %v86_v49, %v85_v48  ;;  %v95_v55 = vmul.f32 %v93_v54, %v85_v48  ;;  %v96_v56 = vmul.f32 %v93_v54, %v86_v49 }
 0x33a   :  { %88 = vadd.xlane.f32.xlu1 %v87_v50 }
 0x3c3   :  { %v89_v51 = vpop.xlane.xlu1 %88 }
 0x3c4   :  { %v90_v52 = vmul.f32 0.00390625, %v89_v51 }
 0x3c6   :  { %v97_v53 = vmul.f32 %v90_v52, %v18_v6 }
 0x3c8   :  { %100 = vperm.xlu1 %136, %v97_v53  }
 0x443   :  { %v101_v57 = vpop.permute.xlu1 %100 }
 0x444   :  { %v103_v58 = vadd.f32 %v101_v57, %v95_v55  ;;  %v104_v59 = vadd.f32 %v101_v57, %v96_v56 }
 0x446   :  { %v105_v60 = vmax.f32 %v103_v58, 0.0  ;;  %v106_v61 = vmax.f32 %v104_v59, 0.0 }
 0x448   :  { %v107_v62 = vmin.f32 %v105_v60, 1.0  ;;  %v108_v63 = vmin.f32 %v106_v61, 1.0 }
 0x44a   :  { %109 = vst [vmem:[#allocation2] sm:$0xff] %v107_v62  ;;  %110 = vst [vmem:[#allocation2 + $0x8] sm:$0xff] %v108_v63 }
 0x44b   :  { %148 = shalt.err (!%p145_p4)
}
 0x44c   :  { %120 = dma.vmem_to_hbm [thread:$0]  %s118_s1, 256, %s202_s3, [#allocation3]  }
 0x44d   :  { %157 = dma.done.wait [#allocation3], 256  }
 0x44e   :  { %158 = vsyncadd [#allocation3], 4294967040 }
 0x44f   :  { %124 = vsyncpa [#allocation3], 1 }

</bundles_post_ra>
